<compile_context>
chip_gen: v6e
topology: v6e:2x2x1
jax: 0.10.0
libtpu: 0.0.40
codegen_flags: <defaults>
</compile_context>

<pallas_src>
import functools

import jax
import jax.numpy as jnp
from jax.experimental import pallas as pl
from jax.experimental.pallas import tpu as pltpu

HIDDEN = 128
N_RES_BLOCKS = 3
BIAS_ROWS = 16          # padded sublane count for the packed bias/head operand
DEFAULT_BLOCK_B = 1024  # outer batch tile (rows DMA'd per grid step)
CHUNK_B = 128           # inner compute sub-chunk (bounds vreg live ranges)


def critic_resnet9_kernel(x_ref, wfc_ref, wres_ref, bias_ref, out_ref, *,
                          n_chunks, chunk):
    # Packed f32 bias / head operand, loaded once per grid step (loop-invariant):
    #   row 0      : fc bias
    #   rows 1..6  : residual biases b11, b12, b21, b22, b31, b32
    #   row 7      : output-head weight row (128,)
    #   row 8[0]   : output-head bias
    bias = bias_ref[...]
    bfc = bias[0:1, :]
    wout = bias[7:8, :]
    bout = bias[8:9, 0:1]

    def body(c):
        r0 = pl.multiple_of(c * chunk, chunk)
        x = x_ref[pl.ds(r0, chunk), :].astype(jnp.bfloat16)

        # Input projection: concat(state, action) @ Wfc  (bf16 MXU, f32 acc).
        h = jnp.dot(x, wfc_ref[...], preferred_element_type=jnp.float32)
        h = jnp.maximum(h + bfc, 0.0)                       # (chunk, 128) f32

        # 3 residual blocks: relu(fc2(relu(fc1(h))) + h)
        for blk in range(N_RES_BLOCKS):
            w1 = wres_ref[2 * blk]          # (128, 128) bf16
            w2 = wres_ref[2 * blk + 1]      # (128, 128) bf16
            b1 = bias[1 + 2 * blk: 2 + 2 * blk, :]
            b2 = bias[2 + 2 * blk: 3 + 2 * blk, :]
            o = jnp.dot(h.astype(jnp.bfloat16), w1,
                        preferred_element_type=jnp.float32) + b1
            o = jnp.maximum(o, 0.0)
            o = jnp.dot(o.astype(jnp.bfloat16), w2,
                        preferred_element_type=jnp.float32) + b2
            h = jnp.maximum(o + h, 0.0)

        # Output head (128 -> 1) off the MXU: VPU multiply + XLU lane reduce.
        v = jnp.sum(h * wout, axis=-1, keepdims=True) + bout
        out_ref[pl.ds(r0, chunk), :] = v.astype(out_ref.dtype)

    if n_chunks == 1:
        body(0)
    else:
        pl.loop(0, n_chunks)(body)


def prepare_params(params):
    """One-time packing/casting of parameters (keep OUT of the per-call path).

    Returns {"wfc": (in_dim,128) bf16, "wres": (6,128,128) bf16,
             "bias": (16,128) f32 packed as documented in the kernel}."""
    wfc = params["wfc"].astype(jnp.bfloat16)
    wres = jnp.stack(
        [params["w11"], params["w12"],
         params["w21"], params["w22"],
         params["w31"], params["w32"]], axis=0).astype(jnp.bfloat16)

    bias = jnp.zeros((BIAS_ROWS, HIDDEN), jnp.float32)
    rows = [params["bfc"], params["b11"], params["b12"],
            params["b21"], params["b22"], params["b31"], params["b32"]]
    for r, b in enumerate(rows):
        bias = bias.at[r].set(b.reshape(HIDDEN).astype(jnp.float32))
    bias = bias.at[7].set(params["wout"].reshape(HIDDEN).astype(jnp.float32))
    bias = bias.at[8, 0].set(params["bout"].reshape(()).astype(jnp.float32))
    return {"wfc": wfc, "wres": wres, "bias": bias}


@functools.partial(jax.jit, static_argnames=("block_b",))
def critic_resnet9_forward(state, action, prepared, *, block_b=DEFAULT_BLOCK_B):
    """state: (B, state_dim), action: (B, action_dim). Returns (B, 1) f32."""
    B = state.shape[0]
    x = jnp.concatenate(
        [state.astype(jnp.float32), action.astype(jnp.float32)], axis=-1)
    in_dim = x.shape[1]

    # Outer batch tile (tb) and inner compute chunk.  tb is a multiple of the
    # chunk so the inner loop needs no masking; batch is padded up to a
    # multiple of tb and sliced back at the end.
    block_b = max(CHUNK_B, (block_b // CHUNK_B) * CHUNK_B)
    b8 = ((B + 7) // 8) * 8
    if b8 <= CHUNK_B:
        tb = b8
        chunk = tb
    else:
        tb = min(block_b, ((B + CHUNK_B - 1) // CHUNK_B) * CHUNK_B)
        chunk = CHUNK_B
    n_chunks = tb // chunk
    num_tiles = pl.cdiv(B, tb)
    b_pad = num_tiles * tb
    if b_pad != B:
        x = jnp.pad(x, ((0, b_pad - B), (0, 0)))

    wfc = prepared["wfc"]
    wres = prepared["wres"]
    bias = prepared["bias"]

    kernel = functools.partial(
        critic_resnet9_kernel, n_chunks=n_chunks, chunk=chunk)

    out = pl.pallas_call(
        kernel,
        out_shape=jax.ShapeDtypeStruct((b_pad, 1), jnp.float32),
        grid=(num_tiles,),
        in_specs=[
            # Batch-tiled activations.
            pl.BlockSpec((tb, in_dim), lambda i: (i, 0)),
            # Weights/biases: full block, constant index -> VMEM-resident.
            pl.BlockSpec(wfc.shape, lambda i: (0, 0)),
            pl.BlockSpec(wres.shape, lambda i: (0, 0, 0)),
            pl.BlockSpec(bias.shape, lambda i: (0, 0)),
        ],
        out_specs=pl.BlockSpec((tb, 1), lambda i: (i, 0)),
        compiler_params=pltpu.CompilerParams(
            # TODO(synk): on v7x, verify in a profile that both TensorCores are
            # busy; if not, switch to pltpu.CORE_PARALLEL on a leading axis.
            dimension_semantics=("parallel",)),
    )(x, wfc, wres, bias)

    return out[:B]


def init_params(key, in_dim, init_w=0.003):
    """Parameter init mirroring nn.Linear defaults (uniform +-1/sqrt(fan_in));
    the output layer uses +-init_w.  Weights stored as (in, out)."""
    def linear_init(k, fan_in, fan_out, bound=None):
        if bound is None:
            bound = 1.0 / jnp.sqrt(fan_in)
        kw, kb = jax.random.split(k)
        w = jax.random.uniform(kw, (fan_in, fan_out), jnp.float32, -bound, bound)
        b = jax.random.uniform(kb, (1, fan_out), jnp.float32, -bound, bound)
        return w, b

    keys = jax.random.split(key, 8)
    params = {}
    params["wfc"], params["bfc"] = linear_init(keys[0], in_dim, HIDDEN)
    params["w11"], params["b11"] = linear_init(keys[1], HIDDEN, HIDDEN)
    params["w12"], params["b12"] = linear_init(keys[2], HIDDEN, HIDDEN)
    params["w21"], params["b21"] = linear_init(keys[3], HIDDEN, HIDDEN)
    params["w22"], params["b22"] = linear_init(keys[4], HIDDEN, HIDDEN)
    params["w31"], params["b31"] = linear_init(keys[5], HIDDEN, HIDDEN)
    params["w32"], params["b32"] = linear_init(keys[6], HIDDEN, HIDDEN)
    params["wout"], params["bout"] = linear_init(keys[7], HIDDEN, 1, bound=init_w)
    return params


def reference_forward_f32(state, action, params):
    """Pure-f32 JAX reference (exact module semantics)."""
    x = jnp.concatenate([state, action], axis=-1).astype(jnp.float32)
    h = jnp.maximum(x @ params["wfc"] + params["bfc"], 0.0)
    for i in ("1", "2", "3"):
        r = h
        o = jnp.maximum(h @ params[f"w{i}1"] + params[f"b{i}1"], 0.0)
        o = o @ params[f"w{i}2"] + params[f"b{i}2"]
        h = jnp.maximum(o + r, 0.0)
    return h @ params["wout"] + params["bout"]


def reference_forward_bf16(state, action, params):
    """JAX reference mirroring the kernel's bf16-MXU / f32-accumulate numerics."""
    x = jnp.concatenate([state, action], axis=-1).astype(jnp.bfloat16)
    h = jnp.dot(x, params["wfc"].astype(jnp.bfloat16),
                preferred_element_type=jnp.float32)
    h = jnp.maximum(h + params["bfc"], 0.0)
    for i in ("1", "2", "3"):
        r = h
        o = jnp.dot(h.astype(jnp.bfloat16), params[f"w{i}1"].astype(jnp.bfloat16),
                    preferred_element_type=jnp.float32) + params[f"b{i}1"]
        o = jnp.maximum(o, 0.0)
        o = jnp.dot(o.astype(jnp.bfloat16), params[f"w{i}2"].astype(jnp.bfloat16),
                    preferred_element_type=jnp.float32) + params[f"b{i}2"]
        h = jnp.maximum(o + r, 0.0)
    wout_row = params["wout"].reshape(1, HIDDEN)
    return jnp.sum(h * wout_row, axis=-1, keepdims=True) + params["bout"].reshape(1, 1)


if __name__ == "__main__":
    key = jax.random.PRNGKey(0)
    k_state, k_action, k_params = jax.random.split(key, 3)

    state_dim = 24
    action_dim = 8
    in_dim = state_dim + action_dim

    params = init_params(k_params, in_dim)
    prepared = prepare_params(params)  # one-time packing, outside the hot path

    # --- small batch (single sub-chunk path) ---
    batch = 4
    state = jax.random.normal(k_state, (batch, state_dim), jnp.float32)
    action = jax.random.normal(k_action, (batch, action_dim), jnp.float32)

    value = critic_resnet9_forward(state, action, prepared)
    value = jax.block_until_ready(value)
    assert value.shape == (batch, 1)

    ref_bf16 = reference_forward_bf16(state, action, params)
    assert jnp.allclose(value, ref_bf16, atol=1e-3, rtol=1e-3), (value, ref_bf16)
    ref_f32 = reference_forward_f32(state, action, params)
    assert jnp.allclose(value, ref_f32, atol=2e-2, rtol=2e-2), (value, ref_f32)

    # --- larger batch (exercises padding + inner sub-chunk loop) ---
    batch2 = 260
    k_s2, k_a2 = jax.random.split(jax.random.PRNGKey(1))
    state2 = jax.random.normal(k_s2, (batch2, state_dim), jnp.float32)
    action2 = jax.random.normal(k_a2, (batch2, action_dim), jnp.float32)

    value2 = critic_resnet9_forward(state2, action2, prepared)
    value2 = jax.block_until_ready(value2)
    assert value2.shape == (batch2, 1)

    ref2_bf16 = reference_forward_bf16(state2, action2, params)
    assert jnp.allclose(value2, ref2_bf16, atol=1e-3, rtol=1e-3)
    ref2_f32 = reference_forward_f32(state2, action2, params)
    assert jnp.allclose(value2, ref2_f32, atol=2e-2, rtol=2e-2)

    print("KERNEL_OK")
</pallas_src>

<mosaic_0001>
module attributes {stable_mosaic.version = 11 : i64} {
  func.func @critic_resnet9_kernel(%arg0: i32, %arg1: memref<8x32xf32, #tpu.memory_space<vmem>>, %arg2: memref<32x128xbf16, #tpu.memory_space<vmem>>, %arg3: memref<6x128x128xbf16, #tpu.memory_space<vmem>>, %arg4: memref<16x128xf32, #tpu.memory_space<vmem>>, %arg5: memref<8x1xf32, #tpu.memory_space<vmem>>) attributes {dimension_semantics = [#tpu.dimension_semantics<parallel>], iteration_bounds = array<i64: 1>, scalar_prefetch = 0 : i64, scratch_operands = 0 : i64, tpu.core_type = #tpu.core_type<tc>, window_params = [{transform_indices = @transform_0, window_bounds = array<i64: 8, 32>}, {pipeline_mode = #tpu.pipeline_mode<synchronous>, transform_indices = @transform_1, window_bounds = array<i64: 32, 128>}, {pipeline_mode = #tpu.pipeline_mode<synchronous>, transform_indices = @transform_2, window_bounds = array<i64: 6, 128, 128>}, {pipeline_mode = #tpu.pipeline_mode<synchronous>, transform_indices = @transform_3, window_bounds = array<i64: 16, 128>}, {transform_indices = @transform_4, window_bounds = array<i64: 8, 1>}]} {
    %c0 = arith.constant 0 : index
    %c0_0 = arith.constant 0 : index
    %0 = vector.load %arg4[%c0, %c0_0] : memref<16x128xf32, #tpu.memory_space<vmem>>, vector<16x128xf32>
    %1 = vector.extract_strided_slice %0 {offsets = [0, 0], sizes = [1, 128], strides = [1, 1]} : vector<16x128xf32> to vector<1x128xf32>
    %2 = vector.extract_strided_slice %0 {offsets = [7, 0], sizes = [1, 128], strides = [1, 1]} : vector<16x128xf32> to vector<1x128xf32>
    %3 = vector.extract_strided_slice %0 {offsets = [8, 0], sizes = [1, 1], strides = [1, 1]} : vector<16x128xf32> to vector<1x1xf32>
    %c0_i32 = arith.constant 0 : i32
    %4 = tpu.assume_multiple %c0_i32, 8 : i32
    %5 = arith.index_cast %4 : i32 to index
    %c0_1 = arith.constant 0 : index
    %6 = vector.load %arg1[%5, %c0_1] : memref<8x32xf32, #tpu.memory_space<vmem>>, vector<8x32xf32>
    %7 = arith.truncf %6 : vector<8x32xf32> to vector<8x32xbf16>
    %c0_2 = arith.constant 0 : index
    %c0_3 = arith.constant 0 : index
    %8 = vector.load %arg2[%c0_2, %c0_3] : memref<32x128xbf16, #tpu.memory_space<vmem>>, vector<32x128xbf16>
    %cst = arith.constant dense<0.000000e+00> : vector<8x128xf32>
    %9 = tpu.matmul %7, %8, %cst {dimension_numbers = #tpu.dot_dimension_numbers<[1], [0], [0], [1], [0, 0, 1, 1], [], []>} : vector<8x32xbf16>, vector<32x128xbf16>, vector<8x128xf32> -> vector<8x128xf32>
    %10 = vector.broadcast %1 : vector<1x128xf32> to vector<8x128xf32>
    %11 = arith.addf %9, %10 : vector<8x128xf32>
    %cst_4 = arith.constant 0.000000e+00 : f32
    %12 = vector.broadcast %cst_4 : f32 to vector<8x128xf32>
    %13 = arith.maximumf %11, %12 : vector<8x128xf32>
    %c0_5 = arith.constant 0 : index
    %c0_6 = arith.constant 0 : index
    %c0_7 = arith.constant 0 : index
    %14 = vector.load %arg3[%c0_5, %c0_6, %c0_7] : memref<6x128x128xbf16, #tpu.memory_space<vmem>>, vector<1x128x128xbf16>
    %15 = vector.shape_cast %14 : vector<1x128x128xbf16> to vector<128x128xbf16>
    %c1 = arith.constant 1 : index
    %c0_8 = arith.constant 0 : index
    %c0_9 = arith.constant 0 : index
    %16 = vector.load %arg3[%c1, %c0_8, %c0_9] : memref<6x128x128xbf16, #tpu.memory_space<vmem>>, vector<1x128x128xbf16>
    %17 = vector.shape_cast %16 : vector<1x128x128xbf16> to vector<128x128xbf16>
    %18 = vector.extract_strided_slice %0 {offsets = [1, 0], sizes = [1, 128], strides = [1, 1]} : vector<16x128xf32> to vector<1x128xf32>
    %19 = vector.extract_strided_slice %0 {offsets = [2, 0], sizes = [1, 128], strides = [1, 1]} : vector<16x128xf32> to vector<1x128xf32>
    %20 = arith.truncf %13 : vector<8x128xf32> to vector<8x128xbf16>
    %cst_10 = arith.constant dense<0.000000e+00> : vector<8x128xf32>
    %21 = tpu.matmul %20, %15, %cst_10 {dimension_numbers = #tpu.dot_dimension_numbers<[1], [0], [0], [1], [0, 0, 1, 1], [], []>} : vector<8x128xbf16>, vector<128x128xbf16>, vector<8x128xf32> -> vector<8x128xf32>
    %22 = vector.broadcast %18 : vector<1x128xf32> to vector<8x128xf32>
    %23 = arith.addf %21, %22 : vector<8x128xf32>
    %cst_11 = arith.constant 0.000000e+00 : f32
    %24 = vector.broadcast %cst_11 : f32 to vector<8x128xf32>
    %25 = arith.maximumf %23, %24 : vector<8x128xf32>
    %26 = arith.truncf %25 : vector<8x128xf32> to vector<8x128xbf16>
    %cst_12 = arith.constant dense<0.000000e+00> : vector<8x128xf32>
    %27 = tpu.matmul %26, %17, %cst_12 {dimension_numbers = #tpu.dot_dimension_numbers<[1], [0], [0], [1], [0, 0, 1, 1], [], []>} : vector<8x128xbf16>, vector<128x128xbf16>, vector<8x128xf32> -> vector<8x128xf32>
    %28 = vector.broadcast %19 : vector<1x128xf32> to vector<8x128xf32>
    %29 = arith.addf %27, %28 : vector<8x128xf32>
    %30 = arith.addf %29, %13 : vector<8x128xf32>
    %cst_13 = arith.constant 0.000000e+00 : f32
    %31 = vector.broadcast %cst_13 : f32 to vector<8x128xf32>
    %32 = arith.maximumf %30, %31 : vector<8x128xf32>
    %c2 = arith.constant 2 : index
    %c0_14 = arith.constant 0 : index
    %c0_15 = arith.constant 0 : index
    %33 = vector.load %arg3[%c2, %c0_14, %c0_15] : memref<6x128x128xbf16, #tpu.memory_space<vmem>>, vector<1x128x128xbf16>
    %34 = vector.shape_cast %33 : vector<1x128x128xbf16> to vector<128x128xbf16>
    %c3 = arith.constant 3 : index
    %c0_16 = arith.constant 0 : index
    %c0_17 = arith.constant 0 : index
    %35 = vector.load %arg3[%c3, %c0_16, %c0_17] : memref<6x128x128xbf16, #tpu.memory_space<vmem>>, vector<1x128x128xbf16>
    %36 = vector.shape_cast %35 : vector<1x128x128xbf16> to vector<128x128xbf16>
    %37 = vector.extract_strided_slice %0 {offsets = [3, 0], sizes = [1, 128], strides = [1, 1]} : vector<16x128xf32> to vector<1x128xf32>
    %38 = vector.extract_strided_slice %0 {offsets = [4, 0], sizes = [1, 128], strides = [1, 1]} : vector<16x128xf32> to vector<1x128xf32>
    %39 = arith.truncf %32 : vector<8x128xf32> to vector<8x128xbf16>
    %cst_18 = arith.constant dense<0.000000e+00> : vector<8x128xf32>
    %40 = tpu.matmul %39, %34, %cst_18 {dimension_numbers = #tpu.dot_dimension_numbers<[1], [0], [0], [1], [0, 0, 1, 1], [], []>} : vector<8x128xbf16>, vector<128x128xbf16>, vector<8x128xf32> -> vector<8x128xf32>
    %41 = vector.broadcast %37 : vector<1x128xf32> to vector<8x128xf32>
    %42 = arith.addf %40, %41 : vector<8x128xf32>
    %cst_19 = arith.constant 0.000000e+00 : f32
    %43 = vector.broadcast %cst_19 : f32 to vector<8x128xf32>
    %44 = arith.maximumf %42, %43 : vector<8x128xf32>
    %45 = arith.truncf %44 : vector<8x128xf32> to vector<8x128xbf16>
    %cst_20 = arith.constant dense<0.000000e+00> : vector<8x128xf32>
    %46 = tpu.matmul %45, %36, %cst_20 {dimension_numbers = #tpu.dot_dimension_numbers<[1], [0], [0], [1], [0, 0, 1, 1], [], []>} : vector<8x128xbf16>, vector<128x128xbf16>, vector<8x128xf32> -> vector<8x128xf32>
    %47 = vector.broadcast %38 : vector<1x128xf32> to vector<8x128xf32>
    %48 = arith.addf %46, %47 : vector<8x128xf32>
    %49 = arith.addf %48, %32 : vector<8x128xf32>
    %cst_21 = arith.constant 0.000000e+00 : f32
    %50 = vector.broadcast %cst_21 : f32 to vector<8x128xf32>
    %51 = arith.maximumf %49, %50 : vector<8x128xf32>
    %c4 = arith.constant 4 : index
    %c0_22 = arith.constant 0 : index
    %c0_23 = arith.constant 0 : index
    %52 = vector.load %arg3[%c4, %c0_22, %c0_23] : memref<6x128x128xbf16, #tpu.memory_space<vmem>>, vector<1x128x128xbf16>
    %53 = vector.shape_cast %52 : vector<1x128x128xbf16> to vector<128x128xbf16>
    %c5 = arith.constant 5 : index
    %c0_24 = arith.constant 0 : index
    %c0_25 = arith.constant 0 : index
    %54 = vector.load %arg3[%c5, %c0_24, %c0_25] : memref<6x128x128xbf16, #tpu.memory_space<vmem>>, vector<1x128x128xbf16>
    %55 = vector.shape_cast %54 : vector<1x128x128xbf16> to vector<128x128xbf16>
    %56 = vector.extract_strided_slice %0 {offsets = [5, 0], sizes = [1, 128], strides = [1, 1]} : vector<16x128xf32> to vector<1x128xf32>
    %57 = vector.extract_strided_slice %0 {offsets = [6, 0], sizes = [1, 128], strides = [1, 1]} : vector<16x128xf32> to vector<1x128xf32>
    %58 = arith.truncf %51 : vector<8x128xf32> to vector<8x128xbf16>
    %cst_26 = arith.constant dense<0.000000e+00> : vector<8x128xf32>
    %59 = tpu.matmul %58, %53, %cst_26 {dimension_numbers = #tpu.dot_dimension_numbers<[1], [0], [0], [1], [0, 0, 1, 1], [], []>} : vector<8x128xbf16>, vector<128x128xbf16>, vector<8x128xf32> -> vector<8x128xf32>
    %60 = vector.broadcast %56 : vector<1x128xf32> to vector<8x128xf32>
    %61 = arith.addf %59, %60 : vector<8x128xf32>
    %cst_27 = arith.constant 0.000000e+00 : f32
    %62 = vector.broadcast %cst_27 : f32 to vector<8x128xf32>
    %63 = arith.maximumf %61, %62 : vector<8x128xf32>
    %64 = arith.truncf %63 : vector<8x128xf32> to vector<8x128xbf16>
    %cst_28 = arith.constant dense<0.000000e+00> : vector<8x128xf32>
    %65 = tpu.matmul %64, %55, %cst_28 {dimension_numbers = #tpu.dot_dimension_numbers<[1], [0], [0], [1], [0, 0, 1, 1], [], []>} : vector<8x128xbf16>, vector<128x128xbf16>, vector<8x128xf32> -> vector<8x128xf32>
    %66 = vector.broadcast %57 : vector<1x128xf32> to vector<8x128xf32>
    %67 = arith.addf %65, %66 : vector<8x128xf32>
    %68 = arith.addf %67, %51 : vector<8x128xf32>
    %cst_29 = arith.constant 0.000000e+00 : f32
    %69 = vector.broadcast %cst_29 : f32 to vector<8x128xf32>
    %70 = arith.maximumf %68, %69 : vector<8x128xf32>
    %71 = vector.broadcast %2 : vector<1x128xf32> to vector<8x128xf32>
    %72 = arith.mulf %70, %71 : vector<8x128xf32>
    %cst_30 = arith.constant dense<0.000000e+00> : vector<8xf32>
    %73 = vector.multi_reduction <add>, %72, %cst_30 [1] : vector<8x128xf32> to vector<8xf32>
    %74 = vector.shape_cast %73 : vector<8xf32> to vector<8x1xf32>
    %75 = vector.broadcast %3 : vector<1x1xf32> to vector<8x1xf32>
    %76 = arith.addf %74, %75 : vector<8x1xf32>
    %77 = arith.index_cast %4 : i32 to index
    %c0_31 = arith.constant 0 : index
    %78 = vector.load %arg5[%77, %c0_31] : memref<8x1xf32, #tpu.memory_space<vmem>>, vector<8x1xf32>
    tpu.vector_store %arg5[%77, %c0_31], %76 {strides = array<i32>} : memref<8x1xf32, #tpu.memory_space<vmem>>, vector<8x1xf32>,
    return
  }
  func.func @transform_0(%arg0: i32) -> (i32, i32) {
    %c0_i32 = arith.constant 0 : i32
    %c0_i32_0 = arith.constant 0 : i32
    return %arg0, %c0_i32 : i32, i32
  }
  func.func @transform_1(%arg0: i32) -> (i32, i32) {
    %c0_i32 = arith.constant 0 : i32
    %c0_i32_0 = arith.constant 0 : i32
    %c0_i32_1 = arith.constant 0 : i32
    return %c0_i32, %c0_i32_0 : i32, i32
  }
  func.func @transform_2(%arg0: i32) -> (i32, i32, i32) {
    %c0_i32 = arith.constant 0 : i32
    %c0_i32_0 = arith.constant 0 : i32
    %c0_i32_1 = arith.constant 0 : i32
    %c0_i32_2 = arith.constant 0 : i32
    return %c0_i32, %c0_i32_0, %c0_i32_1 : i32, i32, i32
  }
  func.func @transform_3(%arg0: i32) -> (i32, i32) {
    %c0_i32 = arith.constant 0 : i32
    %c0_i32_0 = arith.constant 0 : i32
    %c0_i32_1 = arith.constant 0 : i32
    return %c0_i32, %c0_i32_0 : i32, i32
  }
  func.func @transform_4(%arg0: i32) -> (i32, i32) {
    %c0_i32 = arith.constant 0 : i32
    %c0_i32_0 = arith.constant 0 : i32
    return %arg0, %c0_i32 : i32, i32
  }
}

</mosaic_0001>

<bundles_post_ra>
// kernel: critic_resnet9_forward.1
= control target key start
LH: loop header
LB: loop body
LE: loop exit
PB: predicated region body
PF: predicated region fallthrough
CT: control target
= control target key end

     0   :  { %9 = vsyncpa [#allocation3], 0  ;;  %s1290_s0 = inlined_call_operand.vmem [shape: f32[8,32], index: 0, kind: input, shape index: {}]   ;;  %s1291_s1 = inlined_call_operand.vmem [shape: bf16[32,128], index: 1, kind: input, shape index: {}]   ;;  %s1292_s2 = inlined_call_operand.hbm [shape: bf16[6,128,128], index: 2, kind: input, shape index: {}]   ;;  %s1293_s3 = inlined_call_operand.hbm [shape: f32[16,128], index: 3, kind: input, shape index: {}]   ;;  %s1294_s4 = inlined_call_operand.vmem [shape: f32[8,1], index: 4, kind: output, shape index: {}]  }
   0x1   :  { %10 = vsyncpa [#allocation5], 0  ;;  %s1141_s15 = smov [#allocation2]  }
   0x2   :  { %s20_s16 = sshll.u32 %s1141_s15, 4  ;;  %s21_s16 = int_to_ptr.vmem [resolvable:$true] %s20_s16 }
   0x3   :  { %s1105_s17 = scalar_lea.vmem %s21_s16, 6144  ;;  %p1110_p1 = scmp.lt.s32.totalorder %s21_s16, %s21_s16 }
   0x4   :  { %p1106_p0 = scmp.ne.s32.totalorder %s21_s16, %s1105_s17  ;;  %p1111_p2 = scmp.lt.s32.totalorder %s1105_s17, %s1105_s17 }
   0x6   :  { %p1112_p3 = por %p1111_p2, %p1110_p1 }
   0x8   :  { %p1113_p4 = pnand %p1112_p3, %p1106_p0 }
   0xa   :  { %1116 = shalt.err (!%p1113_p4)
}
   0xb   :  { %s1142_s18 = smov 64   ;;  %s1143_s19 = smov 4  }
   0xc   :  { %26 = dma.hbm_to_vmem [thread:$0]  %s1292_s2, 6144, %s21_s16, [#allocation3], %s1142_s18, %s1142_s18, %s1143_s19  }
   0xd   :  { %s1144_s22 = smov [#allocation4]  }
   0xe   :  { %s32_s23 = sshll.u32 %s1144_s22, 4  ;;  %s33_s23 = int_to_ptr.vmem [resolvable:$true] %s32_s23 }
   0xf   :  { %s1125_s24 = scalar_lea.vmem %s33_s23, 256  ;;  %p1130_p6 = scmp.lt.s32.totalorder %s33_s23, %s33_s23 }
  0x10   :  { %p1126_p5 = scmp.ne.s32.totalorder %s33_s23, %s1125_s24  ;;  %p1131_p7 = scmp.lt.s32.totalorder %s1125_s24, %s1125_s24 }
  0x12   :  { %p1132_p8 = por %p1131_p7, %p1130_p6 }
  0x14   :  { %p1133_p9 = pnand %p1132_p8, %p1126_p5 }
  0x16   :  { %1136 = shalt.err (!%p1133_p9)
}
  0x17   :  { %s1145_s25 = smov 128   ;;  %s1146_s26 = smov 8  }
  0x18   :  { %38 = dma.hbm_to_vmem [thread:$0]  %s1293_s3, 256, %s33_s23, [#allocation5], %s1145_s25, %s1145_s25, %s1146_s26  }
  0x19   :  { %1137 = dma.done.wait [#allocation3], 6144  }
  0x1a   :  { %1138 = vsyncadd [#allocation3], 4294961152 }
  0x1b   :  { %1139 = dma.done.wait [#allocation5], 256  }
  0x1c   :  { %1140 = vsyncadd [#allocation5], 4294967040  ;;  %v1147_v0 = vmov 0.0   ;;  %vm1148_vm0 = vmmov 0   ;;  %v1047_v1 = vld [vmem:[%s1291_s1 + $0x8] sm:$0xff]   ;;  %v1048_v2 = vld [vmem:[%s1291_s1] sm:$0xff]   ;;  %v54_v19 = vlaneseq }
  0x1d   :  { %911 = vmatprep.subr.bf16.mxu0 %v1147_v0  ;;  %915 = vmatprep.mubr.msk.bf16.mxu0 %vm1148_vm0, %v1147_v0  ;;  %v48_v3 = vld [vmem:[%s1290_s0] sm:$0xff]  ;;  %v1049_v4 = vld [vmem:[#allocation2 + $0x38] sm:$0xff]   ;;  %v1050_v6 = vld [vmem:[#allocation2 + $0x30] sm:$0xff]   ;;  %vm70_vm1 = vcmask 261120   ;;  %vm795_vm2 = vcmask 7168  }
  0x1e   :  { %919 = vmatprep.subr.bf16.mxu1 %v1147_v0  ;;  %935 = vmatprep.mubr.msk.bf16.mxu1 %vm1148_vm0, %v1147_v0  ;;  %v49_v5 = vpack.c.bf16 %v48_v3, %v48_v3  ;;  %v1051_v7 = vld [vmem:[#allocation2 + $0x28] sm:$0xff]   ;;  %v1052_v8 = vld [vmem:[#allocation2 + $0x20] sm:$0xff]   ;;  %v1053_v9 = vld [vmem:[#allocation2 + $0x18] sm:$0xff]   ;;  %v1213_v20 = vshrl.u32 %v54_v19, 7 }
  0x1f   :  { %912 = vmatpush3.bf16.msra.mxu0 %v1047_v1  ;;  %920 = vmatpush3.bf16.msra.mxu1 %v1049_v4  ;;  %v1054_v10 = vld [vmem:[#allocation2 + $0x10] sm:$0xff]   ;;  %v1055_v11 = vld [vmem:[#allocation2 + $0x8] sm:$0xff]   ;;  %v1056_v12 = vld [vmem:[#allocation2] sm:$0xff]  }
  0x20   :  { %913 = vmatprep.subr.bf16.mxu0 %v1147_v0  ;;  %921 = vmatprep.subr.bf16.mxu1 %v1147_v0  ;;  %v1057_v13 = vld [vmem:[#allocation2 + $0x78] sm:$0xff]   ;;  %v1058_v14 = vld [vmem:[#allocation2 + $0x70] sm:$0xff]   ;;  %v1059_v15 = vld [vmem:[#allocation2 + $0x68] sm:$0xff]   ;;  %v56_v21 = vsub.s32 0, %v1213_v20  ;;  %v151_v39 = vsub.s32 1, %v1213_v20  ;;  %v245_v56 = vsub.s32 2, %v1213_v20 }
  0x21   :  { %v1060_v16 = vld [vmem:[#allocation2 + $0x60] sm:$0xff]   ;;  %v1061_v17 = vld [vmem:[#allocation2 + $0x58] sm:$0xff]   ;;  %v1062_v18 = vld [vmem:[#allocation2 + $0x50] sm:$0xff]  }
  0x22   :  { %v1216_v22 = vld [vmem:[#allocation4] sm:$0xff]  ;;  %v1063_v31 = vld [vmem:[#allocation2 + $0x48] sm:$0xff]   ;;  %v1065_v33 = vld [vmem:[#allocation2 + $0xb8] sm:$0xff]  }
  0x23   :  { %914 = vmatpush3.bf16.msra.mxu0 %v1048_v2  ;;  %922 = vmatpush3.bf16.msra.mxu1 %v1050_v6  ;;  %v57_v23 = vrot.slane %v1216_v22, %v56_v21  ;;  %v1064_v32 = vld [vmem:[#allocation2 + $0x40] sm:$0xff]   ;;  %v1066_v34 = vld [vmem:[#allocation2 + $0xb0] sm:$0xff]   ;;  %v1067_v35 = vld [vmem:[#allocation2 + $0xa8] sm:$0xff]   ;;  %v152_v40 = vrot.slane %v1216_v22, %v151_v39  ;;  %v246_v57 = vrot.slane %v1216_v22, %v245_v56 }
  0x24   :  { %939 = vmatprep.subr.bf16.mxu0 %v1147_v0  ;;  %923 = vmatprep.subr.bf16.mxu1 %v1147_v0  ;;  %v1068_v36 = vld [vmem:[#allocation2 + $0xa0] sm:$0xff]   ;;  %v1069_v37 = vld [vmem:[#allocation2 + $0x98] sm:$0xff]   ;;  %v1070_v38 = vld [vmem:[#allocation2 + $0x90] sm:$0xff]  }
  0x25   :  { %v1071_v48 = vld [vmem:[#allocation2 + $0x88] sm:$0xff]   ;;  %v1072_v49 = vld [vmem:[#allocation2 + $0x80] sm:$0xff]   ;;  %v1073_v50 = vld [vmem:[#allocation2 + $0xf8] sm:$0xff]  }
  0x26   :  { %916 = vmatmul.mubr.msk.bf16.vlgmr.msra.gmra.mxu0 %vm70_vm1, %v49_v5  ;;  %v1074_v51 = vld [vmem:[#allocation2 + $0xf0] sm:$0xff]   ;;  %v1075_v52 = vld [vmem:[#allocation2 + $0xe8] sm:$0xff]   ;;  %v1076_v53 = vld [vmem:[#allocation2 + $0xe0] sm:$0xff]  }
  0x27   :  { %955 = vmatprep.mubr.msk.bf16.mxu0 %vm1148_vm0, %v1147_v0  ;;  %924 = vmatpush3.bf16.msra.mxu1 %v1051_v7  ;;  %v1077_v54 = vld [vmem:[#allocation2 + $0xd8] sm:$0xff]   ;;  %v1078_v55 = vld [vmem:[#allocation2 + $0xd0] sm:$0xff]   ;;  %v1079_v3 = vld [vmem:[#allocation2 + $0xc8] sm:$0xff]  }
  0x28   :  { %925 = vmatprep.subr.bf16.mxu1 %v1147_v0  ;;  %940 = vmatpush3.bf16.msra.mxu0 %v1057_v13  ;;  %v1080_v4 = vld [vmem:[#allocation2 + $0xc0] sm:$0xff]   ;;  %v1081_v5 = vld [vmem:[#allocation2 + $0x138] sm:$0xff]   ;;  %v1082_v6 = vld [vmem:[#allocation2 + $0x130] sm:$0xff]  }
  0x29   :  { %941 = vmatprep.subr.bf16.mxu0 %v1147_v0  ;;  %v1083_v7 = vld [vmem:[#allocation2 + $0x128] sm:$0xff]  }
  0x2b   :  { %926 = vmatpush3.bf16.msra.mxu1 %v1052_v8  ;;  %v1084_v8 = vld [vmem:[#allocation2 + $0x120] sm:$0xff]  }
  0x2c   :  { %927 = vmatprep.subr.bf16.mxu1 %v1147_v0  ;;  %942 = vmatpush3.bf16.msra.mxu0 %v1058_v14 }
  0x2d   :  { %943 = vmatprep.subr.bf16.mxu0 %v1147_v0 }
  0x2f   :  { %928 = vmatpush3.bf16.msra.mxu1 %v1053_v9  ;;  %v1085_v9 = vld [vmem:[#allocation2 + $0x118] sm:$0xff]  }
  0x30   :  { %929 = vmatprep.subr.bf16.mxu1 %v1147_v0  ;;  %944 = vmatpush3.bf16.msra.mxu0 %v1059_v15 }
  0x31   :  { %945 = vmatprep.subr.bf16.mxu0 %v1147_v0 }
  0x33   :  { %930 = vmatpush3.bf16.msra.mxu1 %v1054_v10  ;;  %v1086_v10 = vld [vmem:[#allocation2 + $0x110] sm:$0xff]  }
  0x34   :  { %931 = vmatprep.subr.bf16.mxu1 %v1147_v0  ;;  %946 = vmatpush3.bf16.msra.mxu0 %v1060_v16 }
  0x35   :  { %947 = vmatprep.subr.bf16.mxu0 %v1147_v0 }
  0x37   :  { %932 = vmatpush3.bf16.msra.mxu1 %v1055_v11  ;;  %v374_v11 = vsub.s32 3, %v1213_v20 }
  0x38   :  { %933 = vmatprep.subr.bf16.mxu1 %v1147_v0  ;;  %948 = vmatpush3.bf16.msra.mxu0 %v1061_v17 }
  0x39   :  { %949 = vmatprep.subr.bf16.mxu0 %v1147_v0 }
  0x3b   :  { %934 = vmatpush3.bf16.msra.mxu1 %v1056_v12  ;;  %v375_v12 = vrot.slane %v1216_v22, %v374_v11 }
  0x3c   :  { %959 = vmatprep.subr.bf16.mxu1 %v1147_v0  ;;  %950 = vmatpush3.bf16.msra.mxu0 %v1062_v18 }
  0x3d   :  { %951 = vmatprep.subr.bf16.mxu0 %v1147_v0 }
  0x40   :  { %952 = vmatpush3.bf16.msra.mxu0 %v1063_v31  ;;  %v468_v31 = vsub.s32 4, %v1213_v20 }
  0x41   :  { %953 = vmatprep.subr.bf16.mxu0 %v1147_v0 }
  0x44   :  { %954 = vmatpush3.bf16.msra.mxu0 %v1064_v32  ;;  %v469_v32 = vrot.slane %v1216_v22, %v468_v31 }
  0x45   :  { %979 = vmatprep.subr.bf16.mxu0 %v1147_v0 }
  0xe6   :  { %v108_v24 = vpop.f32.mrf.mxu0 }
  0xe7   :  { %v109_v25 = vadd.f32 %v108_v24, %v57_v23  ;;  %v1087_v23 = vld [vmem:[#allocation2 + $0x108] sm:$0xff]   ;;  %v1088_v24 = vld [vmem:[#allocation2 + $0x100] sm:$0xff]  }
  0xe8   :  { %v917_v26 = vpop.f32.mrf.mxu0 }
  0xe9   :  { %v1221_v27 = vmax.f32 %v109_v25, 0.0  ;;  %v1089_v25 = vld [vmem:[#allocation2 + $0x178] sm:$0xff]   ;;  %v1090_v26 = vld [vmem:[#allocation2 + $0x170] sm:$0xff]  }
  0xea   :  { %v111_v28 = vpop.f32.mrf.mxu0 }
  0xeb   :  { %v148_v29 = vpack.c.bf16 %v1221_v27, %v1221_v27  ;;  %v1092_v28 = vld [vmem:[#allocation2 + $0x160] sm:$0xff]  }
  0xec   :  { %v918_v30 = vpop.f32.mrf.mxu0 }
  0xed   :  { %936 = vmatmul.mubr.bf16.vlgmr.msra.gmra.mxu1 %v148_v29  ;;  %v1093_v29 = vld [vmem:[#allocation2 + $0x158] sm:$0xff]   ;;  %v1094_v30 = vld [vmem:[#allocation2 + $0x150] sm:$0xff]  }
  0xee   :  { %975 = vmatprep.mubr.msk.bf16.mxu1 %vm1148_vm0, %v1147_v0  ;;  %960 = vmatpush3.bf16.msra.mxu1 %v1065_v33 }
  0xef   :  { %961 = vmatprep.subr.bf16.mxu1 %v1147_v0 }
  0xf2   :  { %962 = vmatpush3.bf16.msra.mxu1 %v1066_v34 }
  0xf3   :  { %963 = vmatprep.subr.bf16.mxu1 %v1147_v0 }
  0xf6   :  { %964 = vmatpush3.bf16.msra.mxu1 %v1067_v35 }
  0xf7   :  { %965 = vmatprep.subr.bf16.mxu1 %v1147_v0 }
  0xfa   :  { %966 = vmatpush3.bf16.msra.mxu1 %v1068_v36 }
  0xfb   :  { %967 = vmatprep.subr.bf16.mxu1 %v1147_v0 }
  0xfe   :  { %968 = vmatpush3.bf16.msra.mxu1 %v1069_v37 }
  0xff   :  { %969 = vmatprep.subr.bf16.mxu1 %v1147_v0 }
 0x102   :  { %970 = vmatpush3.bf16.msra.mxu1 %v1070_v38 }
 0x103   :  { %971 = vmatprep.subr.bf16.mxu1 %v1147_v0 }
 0x106   :  { %972 = vmatpush3.bf16.msra.mxu1 %v1071_v48 }
 0x107   :  { %973 = vmatprep.subr.bf16.mxu1 %v1147_v0 }
 0x10a   :  { %974 = vmatpush3.bf16.msra.mxu1 %v1072_v49 }
 0x10b   :  { %999 = vmatprep.subr.bf16.mxu1 %v1147_v0 }
 0x1ad   :  { %v235_v41 = vpop.f32.mrf.mxu1 }
 0x1ae   :  { %v236_v42 = vadd.f32 %v235_v41, %v152_v40  ;;  %v1095_v41 = vld [vmem:[#allocation2 + $0x148] sm:$0xff]  }
 0x1af   :  { %v937_v43 = vpop.f32.mrf.mxu1 }
 0x1b0   :  { %v241_v44 = vmax.f32 %v236_v42, 0.0  ;;  %v1096_v42 = vld [vmem:[#allocation2 + $0x140] sm:$0xff]   ;;  %v597_v43 = vsub.s32 5, %v1213_v20 }
 0x1b1   :  { %v238_v45 = vpop.f32.mrf.mxu1 }
 0x1b2   :  { %v242_v46 = vpack.c.bf16 %v241_v44, %v241_v44  ;;  %v598_v44 = vrot.slane %v1216_v22, %v597_v43 }
 0x1b3   :  { %v938_v47 = vpop.f32.mrf.mxu1 }
 0x1b4   :  { %956 = vmatmul.mubr.bf16.vlgmr.msra.gmra.mxu0 %v242_v46 }
 0x1b5   :  { %995 = vmatprep.mubr.msk.bf16.mxu0 %vm1148_vm0, %v1147_v0  ;;  %980 = vmatpush3.bf16.msra.mxu0 %v1073_v50 }
 0x1b6   :  { %981 = vmatprep.subr.bf16.mxu0 %v1147_v0 }
 0x1b9   :  { %982 = vmatpush3.bf16.msra.mxu0 %v1074_v51 }
 0x1ba   :  { %983 = vmatprep.subr.bf16.mxu0 %v1147_v0 }
 0x1bd   :  { %984 = vmatpush3.bf16.msra.mxu0 %v1075_v52  ;;  %v691_v52 = vsub.s32 6, %v1213_v20 }
 0x1be   :  { %985 = vmatprep.subr.bf16.mxu0 %v1147_v0 }
 0x1c1   :  { %986 = vmatpush3.bf16.msra.mxu0 %v1076_v53  ;;  %v692_v53 = vrot.slane %v1216_v22, %v691_v52 }
 0x1c2   :  { %987 = vmatprep.subr.bf16.mxu0 %v1147_v0 }
 0x1c5   :  { %988 = vmatpush3.bf16.msra.mxu0 %v1077_v54 }
 0x1c6   :  { %989 = vmatprep.subr.bf16.mxu0 %v1147_v0 }
 0x1c9   :  { %990 = vmatpush3.bf16.msra.mxu0 %v1078_v55 }
 0x1ca   :  { %991 = vmatprep.subr.bf16.mxu0 %v1147_v0 }
 0x1cd   :  { %992 = vmatpush3.bf16.msra.mxu0 %v1079_v3 }
 0x1ce   :  { %993 = vmatprep.subr.bf16.mxu0 %v1147_v0 }
 0x1d1   :  { %994 = vmatpush3.bf16.msra.mxu0 %v1080_v4 }
 0x1d2   :  { %1019 = vmatprep.subr.bf16.mxu0 %v1147_v0 }
 0x274   :  { %v329_v58 = vpop.f32.mrf.mxu0 }
 0x275   :  { %v330_v59 = vadd.f32 %v329_v58, %v246_v57 }
 0x276   :  { %v957_v60 = vpop.f32.mrf.mxu0 }
 0x277   :  { %v335_v61 = vadd.f32 %v330_v59, %v1221_v27  ;;  %v1091_v27 = vld [vmem:[#allocation2 + $0x168] sm:$0xff]  }
 0x278   :  { %v332_v62 = vpop.f32.mrf.mxu0 }
 0x279   :  { %v1250_v63 = vmax.f32 %v335_v61, 0.0 }
 0x27a   :  { %v958_v1 = vpop.f32.mrf.mxu0 }
 0x27b   :  { %v371_v2 = vpack.c.bf16 %v1250_v63, %v1250_v63 }
 0x27d   :  { %976 = vmatmul.mubr.bf16.vlgmr.msra.gmra.mxu1 %v371_v2 }
 0x27e   :  { %1015 = vmatprep.mubr.msk.bf16.mxu1 %vm1148_vm0, %v1147_v0  ;;  %1000 = vmatpush3.bf16.msra.mxu1 %v1081_v5 }
 0x27f   :  { %1001 = vmatprep.subr.bf16.mxu1 %v1147_v0 }
 0x282   :  { %1002 = vmatpush3.bf16.msra.mxu1 %v1082_v6 }
 0x283   :  { %1003 = vmatprep.subr.bf16.mxu1 %v1147_v0 }
 0x286   :  { %1004 = vmatpush3.bf16.msra.mxu1 %v1083_v7 }
 0x287   :  { %1005 = vmatprep.subr.bf16.mxu1 %v1147_v0 }
 0x28a   :  { %1006 = vmatpush3.bf16.msra.mxu1 %v1084_v8 }
 0x28b   :  { %1007 = vmatprep.subr.bf16.mxu1 %v1147_v0 }
 0x28e   :  { %1008 = vmatpush3.bf16.msra.mxu1 %v1085_v9 }
 0x28f   :  { %1009 = vmatprep.subr.bf16.mxu1 %v1147_v0 }
 0x292   :  { %1010 = vmatpush3.bf16.msra.mxu1 %v1086_v10 }
 0x293   :  { %1011 = vmatprep.subr.bf16.mxu1 %v1147_v0 }
 0x296   :  { %1012 = vmatpush3.bf16.msra.mxu1 %v1087_v23 }
 0x297   :  { %1013 = vmatprep.subr.bf16.mxu1 %v1147_v0 }
 0x29a   :  { %1014 = vmatpush3.bf16.msra.mxu1 %v1088_v24 }
 0x33d   :  { %v458_v13 = vpop.f32.mrf.mxu1 }
 0x33e   :  { %v459_v14 = vadd.f32 %v458_v13, %v375_v12 }
 0x33f   :  { %v977_v15 = vpop.f32.mrf.mxu1 }
 0x340   :  { %v464_v16 = vmax.f32 %v459_v14, 0.0 }
 0x341   :  { %v461_v17 = vpop.f32.mrf.mxu1 }
 0x342   :  { %v465_v18 = vpack.c.bf16 %v464_v16, %v464_v16 }
 0x343   :  { %v978_v19 = vpop.f32.mrf.mxu1 }
 0x344   :  { %996 = vmatmul.mubr.bf16.vlgmr.msra.gmra.mxu0 %v465_v18 }
 0x345   :  { %1035 = vmatprep.mubr.msk.bf16.mxu0 %vm1148_vm0, %v1147_v0  ;;  %1020 = vmatpush3.bf16.msra.mxu0 %v1089_v25 }
 0x346   :  { %1021 = vmatprep.subr.bf16.mxu0 %v1147_v0 }
 0x349   :  { %1022 = vmatpush3.bf16.msra.mxu0 %v1090_v26 }
 0x34a   :  { %1023 = vmatprep.subr.bf16.mxu0 %v1147_v0 }
 0x34d   :  { %1024 = vmatpush3.bf16.msra.mxu0 %v1091_v27 }
 0x34e   :  { %1025 = vmatprep.subr.bf16.mxu0 %v1147_v0 }
 0x351   :  { %1026 = vmatpush3.bf16.msra.mxu0 %v1092_v28 }
 0x352   :  { %1027 = vmatprep.subr.bf16.mxu0 %v1147_v0 }
 0x355   :  { %1028 = vmatpush3.bf16.msra.mxu0 %v1093_v29 }
 0x356   :  { %1029 = vmatprep.subr.bf16.mxu0 %v1147_v0 }
 0x359   :  { %1030 = vmatpush3.bf16.msra.mxu0 %v1094_v30 }
 0x35a   :  { %1031 = vmatprep.subr.bf16.mxu0 %v1147_v0 }
 0x35d   :  { %1032 = vmatpush3.bf16.msra.mxu0 %v1095_v41 }
 0x35e   :  { %1033 = vmatprep.subr.bf16.mxu0 %v1147_v0  ;;  %v785_v0 = vsub.s32 7, %v1213_v20 }
 0x360   :  { %v786_v58 = vrot.slane %v1216_v22, %v785_v0 }
 0x361   :  { %1034 = vmatpush3.bf16.msra.mxu0 %v1096_v42 }
 0x404   :  { %v552_v33 = vpop.f32.mrf.mxu0 }
 0x405   :  { %v553_v34 = vadd.f32 %v552_v33, %v469_v32 }
 0x406   :  { %v997_v35 = vpop.f32.mrf.mxu0 }
 0x407   :  { %v558_v36 = vadd.f32 %v553_v34, %v1250_v63  ;;  %v47_v63 = vld [vmem:[#allocation4 + $0x8] sm:$0xff] }
 0x408   :  { %v555_v37 = vpop.f32.mrf.mxu0  ;;  %v793_v1 = vrot.slane %v47_v63, %v56_v21 }
 0x409   :  { %v559_v38 = vmax.f32 %v558_v36, 0.0 }
 0x40a   :  { %v998_v39 = vpop.f32.mrf.mxu0 }
 0x40b   :  { %v594_v40 = vpack.c.bf16 %v559_v38, %v559_v38 }
 0x40d   :  { %1016 = vmatmul.mubr.bf16.vlgmr.msra.gmra.mxu1 %v594_v40 }
 0x4cd   :  { %v681_v45 = vpop.f32.mrf.mxu1 }
 0x4ce   :  { %v682_v46 = vadd.f32 %v681_v45, %v598_v44 }
 0x4cf   :  { %v1017_v47 = vpop.f32.mrf.mxu1 }
 0x4d0   :  { %v687_v48 = vmax.f32 %v682_v46, 0.0 }
 0x4d1   :  { %v684_v49 = vpop.f32.mrf.mxu1 }
 0x4d2   :  { %v688_v50 = vpack.c.bf16 %v687_v48, %v687_v48 }
 0x4d3   :  { %v1018_v51 = vpop.f32.mrf.mxu1 }
 0x4d4   :  { %1036 = vmatmul.mubr.bf16.vlgmr.msra.gmra.mxu0 %v688_v50 }
 0x594   :  { %v775_v54 = vpop.f32.mrf.mxu0 }
 0x595   :  { %v776_v55 = vadd.f32 %v775_v54, %v692_v53 }
 0x596   :  { %v1037_v56 = vpop.f32.mrf.mxu0 }
 0x597   :  { %v781_v57 = vadd.f32 %v776_v55, %v559_v38 }
 0x598   :  { %v778_v59 = vpop.f32.mrf.mxu0 }
 0x599   :  { %v782_v60 = vmax.f32 %v781_v57, 0.0 }
 0x59a   :  { %v1038_v61 = vpop.f32.mrf.mxu0 }
 0x59b   :  { %v787_v62 = vmul.f32 %v786_v58, %v782_v60 }
 0x59d   :  { %788 = vadd.xlane.f32.xlu0 %v787_v62 }
 0x626   :  { %v789_v2 = vpop.xlane.xlu0 %788 }
 0x627   :  { %v794_v3 = vadd.f32 %v793_v1, %v789_v2 }
 0x629   :  { %796 = vst.msk [vmem:[%s1294_s4] sm:$0xff] %vm795_vm2, %v794_v3 }
 0x62a   :  { %801 = vsyncpa [#allocation3], 1 }
 0x62b   :  { %802 = vsyncpa [#allocation5], 1 }

</bundles_post_ra>
